<compile_context>
chip_gen: v6e
topology: v6e:2x2x1
jax: 0.10.0
libtpu: 0.0.40
codegen_flags: <defaults>
</compile_context>

<pallas_src>
import functools

import jax
import jax.numpy as jnp
from jax.experimental import pallas as pl
from jax.experimental.pallas import tpu as pltpu

# ----------------------------- config (opt) ---------------------------------
TAU = 0.05          # opt.temperature
DO_BIENCODER = True # opt.do_biencoder
VOCAB = 64
BSZ = 8             # 4 queries (label==1) + 4 contexts (label==0)
SEQ = 16
HIDDEN = 32
NUM_LABELS = 2

VMEM_SPEC = pl.BlockSpec(memory_space=pltpu.MemorySpace.VMEM)


# --------------------------- fused forward kernel ----------------------------
def fused_kernel(tokens_ref, mask_ref, labels_ref, emb_ref, wh_ref, bh_ref,
                 wc_ref, bc_ref, out_ref, *, tau, num_q):
    B, S, _ = tokens_ref.shape
    V, H = emb_ref.shape

    # ----- masked mean pooling as a token-histogram matmul (MXU) -------------
    tokens = tokens_ref[...]                                   # (B, S, 1) int32
    mask = mask_ref[...]                                       # (B, S, 1) f32
    vocab_ids = jax.lax.broadcasted_iota(jnp.int32, (B, S, V), 2)
    onehot = (tokens == vocab_ids).astype(jnp.float32) * mask  # (B, S, V)
    hist = jnp.sum(onehot, axis=1)                             # (B, V)
    # each valid one-hot row sums to exactly 1 => row-sum(hist) == mask.sum(1)
    denom = jnp.sum(hist, axis=1, keepdims=True) + 1e-6        # (B, 1)
    pooled = jnp.dot(hist, emb_ref[...],
                     preferred_element_type=jnp.float32) / denom   # (B, H)

    # ----- encoder body -------------------------------------------------------
    hidden = jnp.tanh(
        jnp.dot(pooled, wh_ref[...], preferred_element_type=jnp.float32)
        + bh_ref[...])                                         # (B, H)
    logits = (jnp.dot(hidden, wc_ref[...], preferred_element_type=jnp.float32)
              + bc_ref[...])                                   # (B, C)

    # ----- cross-entropy over classifier logits (reduction='mean') -----------
    labels = labels_ref[...]                                   # (B, 1) int32
    C = logits.shape[1]
    class_ids = jax.lax.broadcasted_iota(jnp.int32, (B, C), 1)
    onehot_lab = (class_ids == labels).astype(jnp.float32)     # (B, C)
    row_max = jnp.max(logits, axis=-1, keepdims=True)          # (B, 1)
    lse = row_max + jnp.log(
        jnp.sum(jnp.exp(logits - row_max), axis=-1, keepdims=True))   # (B, 1)
    picked = jnp.sum(logits * onehot_lab, axis=-1, keepdims=True)     # (B, 1)
    ce = jnp.sum(lse - picked, axis=0, keepdims=True) / B             # (1, 1)

    # ----- accuracy: argmax(logits) == label (first-index tie-break) ---------
    is_max = logits == row_max
    pred = jnp.min(jnp.where(is_max, class_ids, C), axis=-1, keepdims=True)
    correct = (pred == labels).astype(jnp.float32)                    # (B, 1)
    acc = 100.0 * jnp.sum(correct, axis=0, keepdims=True) / B         # (1, 1)

    # ----- in-batch bi-encoder loss: einsum('id,jd->ij', q/tau, c) -----------
    q = hidden[:num_q] * (1.0 / tau)                           # (n, H) static slice
    c = hidden[num_q:]                                         # (n, H)
    scores = jax.lax.dot_general(q, c, (((1,), (1,)), ((), ())),
                                 preferred_element_type=jnp.float32)  # (n, n)
    n = scores.shape[0]
    eye = (jax.lax.broadcasted_iota(jnp.int32, (n, n), 0)
           == jax.lax.broadcasted_iota(jnp.int32, (n, n), 1)).astype(jnp.float32)
    smax = jnp.max(scores, axis=-1, keepdims=True)
    slse = smax + jnp.log(
        jnp.sum(jnp.exp(scores - smax), axis=-1, keepdims=True))
    diag = jnp.sum(scores * eye, axis=-1, keepdims=True)
    be = jnp.sum(slse - diag, axis=0, keepdims=True) / n              # (1, 1)

    # ----- pack [ce, acc, be, loss] into a single lane-dense (1, 128) row ----
    lane = jax.lax.broadcasted_iota(jnp.int32, (1, 128), 1)
    packed = (ce * (lane == 0).astype(jnp.float32)
              + acc * (lane == 1).astype(jnp.float32)
              + be * (lane == 2).astype(jnp.float32)
              + (ce + be) * (lane == 3).astype(jnp.float32))
    out_ref[...] = packed


# ------------------------------ wrapper --------------------------------------
@jax.jit
def bi_cross_encoder_forward(params, tokens, attn_masks, labels):
    """Mirrors BiCrossEncoder.forward with curr_mask_ratio == 0.

    Assumes the fixed in-batch layout: rows [0, B//2) are queries (label==1),
    rows [B//2, B) are contexts (label==0), so the bi-encoder split is static.
    """
    emb_table, wh, bh, wc, bc = params
    B, S = tokens.shape
    # glue: free layout plumbing only (reshape/cast), no gather, no slab in HBM
    tokens3 = tokens.astype(jnp.int32).reshape(B, S, 1)
    mask3 = attn_masks.astype(jnp.float32).reshape(B, S, 1)
    labels2d = labels.astype(jnp.int32).reshape(B, 1)

    packed = pl.pallas_call(
        functools.partial(fused_kernel, tau=TAU, num_q=B // 2),
        out_shape=jax.ShapeDtypeStruct((1, 128), jnp.float32),
        in_specs=[VMEM_SPEC] * 8,
        out_specs=VMEM_SPEC,
    )(tokens3, mask3, labels2d, emb_table, wh, bh, wc, bc)

    return {
        "loss": packed[0, 3],
        "acc": packed[0, 1],
        "losses": {"loss_ce": packed[0, 0], "loss_be": packed[0, 2]},
    }


# --------------------------- pure-JAX reference ------------------------------
def reference_forward(params, tokens, attn_masks, labels):
    emb_table, wh, bh, wc, bc = params
    emb = emb_table[tokens]
    mask = attn_masks.astype(jnp.float32)
    pooled = (emb * mask[:, :, None]).sum(1) / (mask.sum(1, keepdims=True) + 1e-6)
    hidden = jnp.tanh(pooled @ wh + bh)
    logits = hidden @ wc + bc
    B = logits.shape[0]
    logp = jax.nn.log_softmax(logits, -1)
    ce = -jnp.mean(logp[jnp.arange(B), labels])
    acc = 100.0 * jnp.mean((jnp.argmax(logits, -1) == labels).astype(jnp.float32))
    q = hidden[labels == 1] / TAU
    c = hidden[labels == 0]
    s = jnp.einsum("id,jd->ij", q, c)
    n = s.shape[0]
    be = -jnp.mean(jax.nn.log_softmax(s, -1)[jnp.arange(n), jnp.arange(n)])
    return ce, acc, be, ce + be


# -------------------------------- main ----------------------------------------
if __name__ == "__main__":
    key = jax.random.PRNGKey(0)
    k_emb, k_wh, k_bh, k_wc, k_bc, k_tok, k_msk = jax.random.split(key, 7)

    params = (
        0.1 * jax.random.normal(k_emb, (VOCAB, HIDDEN), jnp.float32),
        0.1 * jax.random.normal(k_wh, (HIDDEN, HIDDEN), jnp.float32),
        0.1 * jax.random.normal(k_bh, (1, HIDDEN), jnp.float32),
        0.1 * jax.random.normal(k_wc, (HIDDEN, NUM_LABELS), jnp.float32),
        0.1 * jax.random.normal(k_bc, (1, NUM_LABELS), jnp.float32),
    )

    tokens = jax.random.randint(k_tok, (BSZ, SEQ), 0, VOCAB, dtype=jnp.int32)
    # attention masks: first (8..SEQ) positions valid, rest padded
    lens = jax.random.randint(k_msk, (BSZ, 1), SEQ // 2, SEQ + 1, dtype=jnp.int32)
    attn_masks = (jnp.arange(SEQ)[None, :] < lens).astype(jnp.int32)
    # first half of the batch are queries (label 1), second half contexts (label 0)
    labels = jnp.concatenate(
        [jnp.ones(BSZ // 2, jnp.int32), jnp.zeros(BSZ // 2, jnp.int32)])

    out = bi_cross_encoder_forward(params, tokens, attn_masks, labels)
    jax.block_until_ready(out["loss"])

    ref_ce, ref_acc, ref_be, ref_loss = reference_forward(
        params, tokens, attn_masks, labels)
    assert jnp.allclose(out["losses"]["loss_ce"], ref_ce, atol=2e-3)
    assert jnp.allclose(out["acc"], ref_acc, atol=1e-3)
    assert jnp.allclose(out["losses"]["loss_be"], ref_be, atol=2e-3)
    assert jnp.allclose(out["loss"], ref_loss, atol=2e-3)

    print("KERNEL_OK")
</pallas_src>

<mosaic_0001>
module attributes {stable_mosaic.version = 11 : i64} {
  func.func @fused_kernel(%arg0: memref<8x16x1xi32, #tpu.memory_space<vmem>>, %arg1: memref<8x16x1xf32, #tpu.memory_space<vmem>>, %arg2: memref<8x1xi32, #tpu.memory_space<vmem>>, %arg3: memref<64x32xf32, #tpu.memory_space<vmem>>, %arg4: memref<32x32xf32, #tpu.memory_space<vmem>>, %arg5: memref<1x32xf32, #tpu.memory_space<vmem>>, %arg6: memref<32x2xf32, #tpu.memory_space<vmem>>, %arg7: memref<1x2xf32, #tpu.memory_space<vmem>>, %arg8: memref<1x128xf32, #tpu.memory_space<vmem>>) attributes {dimension_semantics = [], scalar_prefetch = 0 : i64, scratch_operands = 0 : i64, tpu.core_type = #tpu.core_type<tc>} {
    %c0 = arith.constant 0 : index
    %c0_0 = arith.constant 0 : index
    %c0_1 = arith.constant 0 : index
    %0 = vector.load %arg0[%c0, %c0_0, %c0_1] : memref<8x16x1xi32, #tpu.memory_space<vmem>>, vector<8x16x1xi32>
    %c0_2 = arith.constant 0 : index
    %c0_3 = arith.constant 0 : index
    %c0_4 = arith.constant 0 : index
    %1 = vector.load %arg1[%c0_2, %c0_3, %c0_4] : memref<8x16x1xf32, #tpu.memory_space<vmem>>, vector<8x16x1xf32>
    %2 = tpu.iota {dimensions = array<i32: 2>} : vector<8x16x64xi32>
    %3 = vector.broadcast %0 : vector<8x16x1xi32> to vector<8x16x64xi32>
    %4 = arith.cmpi eq, %3, %2 : vector<8x16x64xi32>
    %5 = arith.extui %4 : vector<8x16x64xi1> to vector<8x16x64xi32>
    %6 = arith.sitofp %5 : vector<8x16x64xi32> to vector<8x16x64xf32>
    %7 = vector.broadcast %1 : vector<8x16x1xf32> to vector<8x16x64xf32>
    %8 = arith.mulf %6, %7 : vector<8x16x64xf32>
    %cst = arith.constant dense<0.000000e+00> : vector<8x64xf32>
    %9 = vector.multi_reduction <add>, %8, %cst [1] : vector<8x16x64xf32> to vector<8x64xf32>
    %cst_5 = arith.constant dense<0.000000e+00> : vector<8xf32>
    %10 = vector.multi_reduction <add>, %9, %cst_5 [1] : vector<8x64xf32> to vector<8xf32>
    %11 = vector.shape_cast %10 : vector<8xf32> to vector<8x1xf32>
    %cst_6 = arith.constant 9.99999997E-7 : f32
    %12 = vector.broadcast %cst_6 : f32 to vector<8x1xf32>
    %13 = arith.addf %11, %12 : vector<8x1xf32>
    %c0_7 = arith.constant 0 : index
    %c0_8 = arith.constant 0 : index
    %14 = vector.load %arg3[%c0_7, %c0_8] : memref<64x32xf32, #tpu.memory_space<vmem>>, vector<64x32xf32>
    %cst_9 = arith.constant dense<0.000000e+00> : vector<8x32xf32>
    %15 = tpu.matmul %9, %14, %cst_9 {dimension_numbers = #tpu.dot_dimension_numbers<[1], [0], [0], [1], [0, 0, 1, 1], [], []>} : vector<8x64xf32>, vector<64x32xf32>, vector<8x32xf32> -> vector<8x32xf32>
    %16 = vector.broadcast %13 : vector<8x1xf32> to vector<8x32xf32>
    %17 = arith.divf %15, %16 : vector<8x32xf32>
    %c0_10 = arith.constant 0 : index
    %c0_11 = arith.constant 0 : index
    %18 = vector.load %arg4[%c0_10, %c0_11] : memref<32x32xf32, #tpu.memory_space<vmem>>, vector<32x32xf32>
    %cst_12 = arith.constant dense<0.000000e+00> : vector<8x32xf32>
    %19 = tpu.matmul %17, %18, %cst_12 {dimension_numbers = #tpu.dot_dimension_numbers<[1], [0], [0], [1], [0, 0, 1, 1], [], []>} : vector<8x32xf32>, vector<32x32xf32>, vector<8x32xf32> -> vector<8x32xf32>
    %c0_13 = arith.constant 0 : index
    %c0_14 = arith.constant 0 : index
    %20 = vector.load %arg5[%c0_13, %c0_14] : memref<1x32xf32, #tpu.memory_space<vmem>>, vector<1x32xf32>
    %21 = vector.broadcast %20 : vector<1x32xf32> to vector<8x32xf32>
    %22 = arith.addf %19, %21 : vector<8x32xf32>
    %23 = math.tanh %22 : vector<8x32xf32>
    %c0_15 = arith.constant 0 : index
    %c0_16 = arith.constant 0 : index
    %24 = vector.load %arg6[%c0_15, %c0_16] : memref<32x2xf32, #tpu.memory_space<vmem>>, vector<32x2xf32>
    %cst_17 = arith.constant dense<0.000000e+00> : vector<8x2xf32>
    %25 = tpu.matmul %23, %24, %cst_17 {dimension_numbers = #tpu.dot_dimension_numbers<[1], [0], [0], [1], [0, 0, 1, 1], [], []>} : vector<8x32xf32>, vector<32x2xf32>, vector<8x2xf32> -> vector<8x2xf32>
    %c0_18 = arith.constant 0 : index
    %c0_19 = arith.constant 0 : index
    %26 = vector.load %arg7[%c0_18, %c0_19] : memref<1x2xf32, #tpu.memory_space<vmem>>, vector<1x2xf32>
    %27 = vector.broadcast %26 : vector<1x2xf32> to vector<8x2xf32>
    %28 = arith.addf %25, %27 : vector<8x2xf32>
    %c0_20 = arith.constant 0 : index
    %c0_21 = arith.constant 0 : index
    %29 = vector.load %arg2[%c0_20, %c0_21] : memref<8x1xi32, #tpu.memory_space<vmem>>, vector<8x1xi32>
    %30 = tpu.iota {dimensions = array<i32: 1>} : vector<8x2xi32>
    %31 = vector.broadcast %29 : vector<8x1xi32> to vector<8x2xi32>
    %32 = arith.cmpi eq, %30, %31 : vector<8x2xi32>
    %33 = arith.extui %32 : vector<8x2xi1> to vector<8x2xi32>
    %34 = arith.sitofp %33 : vector<8x2xi32> to vector<8x2xf32>
    %cst_22 = arith.constant dense<0xFF800000> : vector<8xf32>
    %35 = vector.multi_reduction <maximumf>, %28, %cst_22 [1] : vector<8x2xf32> to vector<8xf32>
    %36 = vector.shape_cast %35 : vector<8xf32> to vector<8x1xf32>
    %37 = vector.broadcast %36 : vector<8x1xf32> to vector<8x2xf32>
    %38 = arith.subf %28, %37 : vector<8x2xf32>
    %39 = math.exp %38 : vector<8x2xf32>
    %cst_23 = arith.constant dense<0.000000e+00> : vector<8xf32>
    %40 = vector.multi_reduction <add>, %39, %cst_23 [1] : vector<8x2xf32> to vector<8xf32>
    %41 = vector.shape_cast %40 : vector<8xf32> to vector<8x1xf32>
    %42 = math.log %41 : vector<8x1xf32>
    %43 = arith.addf %36, %42 : vector<8x1xf32>
    %44 = arith.mulf %28, %34 : vector<8x2xf32>
    %cst_24 = arith.constant dense<0.000000e+00> : vector<8xf32>
    %45 = vector.multi_reduction <add>, %44, %cst_24 [1] : vector<8x2xf32> to vector<8xf32>
    %46 = vector.shape_cast %45 : vector<8xf32> to vector<8x1xf32>
    %47 = arith.subf %43, %46 : vector<8x1xf32>
    %cst_25 = arith.constant dense<0.000000e+00> : vector<1xf32>
    %48 = vector.multi_reduction <add>, %47, %cst_25 [0] : vector<8x1xf32> to vector<1xf32>
    %49 = vector.shape_cast %48 : vector<1xf32> to vector<1x1xf32>
    %cst_26 = arith.constant 8.000000e+00 : f32
    %50 = vector.broadcast %cst_26 : f32 to vector<1x1xf32>
    %51 = arith.divf %49, %50 : vector<1x1xf32>
    %52 = vector.broadcast %36 : vector<8x1xf32> to vector<8x2xf32>
    %53 = arith.cmpf oeq, %28, %52 : vector<8x2xf32>
    %c2_i32 = arith.constant 2 : i32
    %54 = vector.broadcast %c2_i32 : i32 to vector<8x2xi32>
    %55 = arith.select %53, %30, %54 : vector<8x2xi1>, vector<8x2xi32>
    %cst_27 = arith.constant dense<2147483647> : vector<8xi32>
    %56 = vector.multi_reduction <minsi>, %55, %cst_27 [1] : vector<8x2xi32> to vector<8xi32>
    %57 = vector.shape_cast %56 : vector<8xi32> to vector<8x1xi32>
    %58 = arith.cmpi eq, %57, %29 : vector<8x1xi32>
    %59 = arith.extui %58 : vector<8x1xi1> to vector<8x1xi32>
    %60 = arith.sitofp %59 : vector<8x1xi32> to vector<8x1xf32>
    %cst_28 = arith.constant dense<0.000000e+00> : vector<1xf32>
    %61 = vector.multi_reduction <add>, %60, %cst_28 [0] : vector<8x1xf32> to vector<1xf32>
    %62 = vector.shape_cast %61 : vector<1xf32> to vector<1x1xf32>
    %cst_29 = arith.constant 1.000000e+02 : f32
    %63 = vector.broadcast %cst_29 : f32 to vector<1x1xf32>
    %64 = arith.mulf %63, %62 : vector<1x1xf32>
    %cst_30 = arith.constant 8.000000e+00 : f32
    %65 = vector.broadcast %cst_30 : f32 to vector<1x1xf32>
    %66 = arith.divf %64, %65 : vector<1x1xf32>
    %67 = vector.extract_strided_slice %23 {offsets = [0, 0], sizes = [4, 32], strides = [1, 1]} : vector<8x32xf32> to vector<4x32xf32>
    %cst_31 = arith.constant 2.000000e+01 : f32
    %68 = vector.broadcast %cst_31 : f32 to vector<4x32xf32>
    %69 = arith.mulf %67, %68 : vector<4x32xf32>
    %70 = vector.extract_strided_slice %23 {offsets = [4, 0], sizes = [4, 32], strides = [1, 1]} : vector<8x32xf32> to vector<4x32xf32>
    %cst_32 = arith.constant dense<0.000000e+00> : vector<4x4xf32>
    %71 = tpu.matmul %69, %70, %cst_32 {dimension_numbers = #tpu.dot_dimension_numbers<[1], [1], [0], [0], [0, 0, 1, 0], [], []>} : vector<4x32xf32>, vector<4x32xf32>, vector<4x4xf32> -> vector<4x4xf32>
    %72 = tpu.iota {dimensions = array<i32: 0>} : vector<4x4xi32>
    %73 = tpu.iota {dimensions = array<i32: 1>} : vector<4x4xi32>
    %74 = arith.cmpi eq, %72, %73 : vector<4x4xi32>
    %75 = arith.extui %74 : vector<4x4xi1> to vector<4x4xi32>
    %76 = arith.sitofp %75 : vector<4x4xi32> to vector<4x4xf32>
    %cst_33 = arith.constant dense<0xFF800000> : vector<4xf32>
    %77 = vector.multi_reduction <maximumf>, %71, %cst_33 [1] : vector<4x4xf32> to vector<4xf32>
    %78 = vector.shape_cast %77 : vector<4xf32> to vector<4x1xf32>
    %79 = vector.broadcast %78 : vector<4x1xf32> to vector<4x4xf32>
    %80 = arith.subf %71, %79 : vector<4x4xf32>
    %81 = math.exp %80 : vector<4x4xf32>
    %cst_34 = arith.constant dense<0.000000e+00> : vector<4xf32>
    %82 = vector.multi_reduction <add>, %81, %cst_34 [1] : vector<4x4xf32> to vector<4xf32>
    %83 = vector.shape_cast %82 : vector<4xf32> to vector<4x1xf32>
    %84 = math.log %83 : vector<4x1xf32>
    %85 = arith.addf %78, %84 : vector<4x1xf32>
    %86 = arith.mulf %71, %76 : vector<4x4xf32>
    %cst_35 = arith.constant dense<0.000000e+00> : vector<4xf32>
    %87 = vector.multi_reduction <add>, %86, %cst_35 [1] : vector<4x4xf32> to vector<4xf32>
    %88 = vector.shape_cast %87 : vector<4xf32> to vector<4x1xf32>
    %89 = arith.subf %85, %88 : vector<4x1xf32>
    %cst_36 = arith.constant dense<0.000000e+00> : vector<1xf32>
    %90 = vector.multi_reduction <add>, %89, %cst_36 [0] : vector<4x1xf32> to vector<1xf32>
    %91 = vector.shape_cast %90 : vector<1xf32> to vector<1x1xf32>
    %cst_37 = arith.constant 4.000000e+00 : f32
    %92 = vector.broadcast %cst_37 : f32 to vector<1x1xf32>
    %93 = arith.divf %91, %92 : vector<1x1xf32>
    %94 = tpu.iota {dimensions = array<i32: 1>} : vector<1x128xi32>
    %c0_i32 = arith.constant 0 : i32
    %95 = vector.broadcast %c0_i32 : i32 to vector<1x128xi32>
    %96 = arith.cmpi eq, %94, %95 : vector<1x128xi32>
    %97 = arith.extui %96 : vector<1x128xi1> to vector<1x128xi32>
    %98 = arith.sitofp %97 : vector<1x128xi32> to vector<1x128xf32>
    %99 = vector.broadcast %51 : vector<1x1xf32> to vector<1x128xf32>
    %100 = arith.mulf %99, %98 : vector<1x128xf32>
    %c1_i32 = arith.constant 1 : i32
    %101 = vector.broadcast %c1_i32 : i32 to vector<1x128xi32>
    %102 = arith.cmpi eq, %94, %101 : vector<1x128xi32>
    %103 = arith.extui %102 : vector<1x128xi1> to vector<1x128xi32>
    %104 = arith.sitofp %103 : vector<1x128xi32> to vector<1x128xf32>
    %105 = vector.broadcast %66 : vector<1x1xf32> to vector<1x128xf32>
    %106 = arith.mulf %105, %104 : vector<1x128xf32>
    %107 = arith.addf %100, %106 : vector<1x128xf32>
    %c2_i32_38 = arith.constant 2 : i32
    %108 = vector.broadcast %c2_i32_38 : i32 to vector<1x128xi32>
    %109 = arith.cmpi eq, %94, %108 : vector<1x128xi32>
    %110 = arith.extui %109 : vector<1x128xi1> to vector<1x128xi32>
    %111 = arith.sitofp %110 : vector<1x128xi32> to vector<1x128xf32>
    %112 = vector.broadcast %93 : vector<1x1xf32> to vector<1x128xf32>
    %113 = arith.mulf %112, %111 : vector<1x128xf32>
    %114 = arith.addf %107, %113 : vector<1x128xf32>
    %115 = arith.addf %51, %93 : vector<1x1xf32>
    %c3_i32 = arith.constant 3 : i32
    %116 = vector.broadcast %c3_i32 : i32 to vector<1x128xi32>
    %117 = arith.cmpi eq, %94, %116 : vector<1x128xi32>
    %118 = arith.extui %117 : vector<1x128xi1> to vector<1x128xi32>
    %119 = arith.sitofp %118 : vector<1x128xi32> to vector<1x128xf32>
    %120 = vector.broadcast %115 : vector<1x1xf32> to vector<1x128xf32>
    %121 = arith.mulf %120, %119 : vector<1x128xf32>
    %122 = arith.addf %114, %121 : vector<1x128xf32>
    %c0_39 = arith.constant 0 : index
    %c0_40 = arith.constant 0 : index
    %123 = vector.load %arg8[%c0_39, %c0_40] : memref<1x128xf32, #tpu.memory_space<vmem>>, vector<1x128xf32>
    tpu.vector_store %arg8[%c0_39, %c0_40], %122 {strides = array<i32>} : memref<1x128xf32, #tpu.memory_space<vmem>>, vector<1x128xf32>,
    return
  }
}

</mosaic_0001>

<bundles_post_ra>
// kernel: bi_cross_encoder_forward.1
= control target key start
LH: loop header
LB: loop body
LE: loop exit
PB: predicated region body
PF: predicated region fallthrough
CT: control target
= control target key end

     0   :  { %v924_v0 = vmov 0   ;;  %v925_v5 = vmov 0.0   ;;  %vm926_vm0 = vmmov 0   ;;  %v61_v54 = vlaneseq  ;;  %s1245_s0 = inlined_call_operand.vmem [shape: s32[8,16,1], index: 0, kind: input, shape index: {}]   ;;  %s1246_s1 = inlined_call_operand.vmem [shape: f32[8,16,1], index: 1, kind: input, shape index: {}]   ;;  %s1247_s3 = inlined_call_operand.vmem [shape: f32[64,32], index: 3, kind: input, shape index: {}]   ;;  %s1248_s4 = inlined_call_operand.vmem [shape: f32[32,32], index: 4, kind: input, shape index: {}]   ;;  %s1249_s6 = inlined_call_operand.vmem [shape: f32[32,2], index: 6, kind: input, shape index: {}]   ;;  %s1250_s5 = inlined_call_operand.vmem [shape: f32[1,32], index: 5, kind: input, shape index: {}]   ;;  %s1251_s7 = inlined_call_operand.vmem [shape: f32[1,2], index: 7, kind: input, shape index: {}]   ;;  %s1252_s2 = inlined_call_operand.vmem [shape: s32[8,1], index: 2, kind: input, shape index: {}]   ;;  %s1253_s8 = inlined_call_operand.vmem [shape: f32[1,128], index: 8, kind: output, shape index: {}]  }
   0x1   :  { %911 = vset.pattern.permute.xlu1 %v924_v0  ;;  %910 = vset.pattern.permute.xlu0 %v924_v0  ;;  %v31_v1 = vld [vmem:[%s1245_s0 + $0x10] sm:$0xff]  ;;  %v29_v2 = vld [vmem:[%s1245_s0] sm:$0xff]  ;;  %v32_v3 = vld [vmem:[%s1245_s0 + $0x18] sm:$0xff]  ;;  %vm255_vm9 = vcmask 523264  }
   0x2   :  { %70 = vperm.xlu1 %911, %v31_v1   ;;  %64 = vperm.xlu0 %910, %v29_v2   ;;  %v30_v4 = vld [vmem:[%s1245_s0 + $0x8] sm:$0xff]  ;;  %v33_v7 = vld [vmem:[%s1245_s0 + $0x20] sm:$0xff]  ;;  %v36_v8 = vld [vmem:[%s1245_s0 + $0x38] sm:$0xff]  ;;  %v1107_v57 = vand.u32 127, %v61_v54 }
   0x3   :  { %861 = vmatprep.subr.mxu0 %v925_v5  ;;  %880 = vmatprep.subr.mxu1 %v925_v5  ;;  %v34_v6 = vld [vmem:[%s1245_s0 + $0x28] sm:$0xff]  ;;  %v35_v9 = vld [vmem:[%s1245_s0 + $0x30] sm:$0xff]  ;;  %v45_v11 = vld [vmem:[%s1246_s1] sm:$0xff] }
   0x4   :  { %v46_v10 = vld [vmem:[%s1246_s1 + $0x8] sm:$0xff]  ;;  %v48_v12 = vld [vmem:[%s1246_s1 + $0x18] sm:$0xff]  ;;  %v47_v13 = vld [vmem:[%s1246_s1 + $0x10] sm:$0xff]  ;;  %877 = vmatprep.mubr.msk.f32.mxu0 %vm926_vm0, %v925_v5  ;;  %888 = vmatprep.mubr.msk.f32.mxu1 %vm926_vm0, %v925_v5 }
   0x5   :  { %v38_v14 = vld [vmem:[%s1245_s0 + $0x48] sm:$0xff]  ;;  %v37_v15 = vld [vmem:[%s1245_s0 + $0x40] sm:$0xff]  ;;  %v40_v18 = vld [vmem:[%s1245_s0 + $0x58] sm:$0xff] }
   0x6   :  { %73 = vperm.xlu1 %911, %v32_v3   ;;  %67 = vperm.xlu0 %910, %v30_v4   ;;  %v50_v16 = vld [vmem:[%s1246_s1 + $0x28] sm:$0xff]  ;;  %v49_v17 = vld [vmem:[%s1246_s1 + $0x20] sm:$0xff]  ;;  %v39_v19 = vld [vmem:[%s1245_s0 + $0x50] sm:$0xff] }
   0x7   :  { %v52_v20 = vld [vmem:[%s1246_s1 + $0x38] sm:$0xff]  ;;  %v51_v21 = vld [vmem:[%s1246_s1 + $0x30] sm:$0xff]  ;;  %v42_v22 = vld [vmem:[%s1245_s0 + $0x68] sm:$0xff] }
   0x8   :  { %v41_v23 = vld [vmem:[%s1245_s0 + $0x60] sm:$0xff]  ;;  %v54_v24 = vld [vmem:[%s1246_s1 + $0x48] sm:$0xff]  ;;  %v44_v26 = vld [vmem:[%s1245_s0 + $0x78] sm:$0xff] }
   0x9   :  { %v53_v25 = vld [vmem:[%s1246_s1 + $0x40] sm:$0xff]  ;;  %v43_v27 = vld [vmem:[%s1245_s0 + $0x70] sm:$0xff]  ;;  %v56_v28 = vld [vmem:[%s1246_s1 + $0x58] sm:$0xff] }
   0xa   :  { %79 = vperm.xlu1 %911, %v34_v6   ;;  %76 = vperm.xlu0 %910, %v33_v7   ;;  %v55_v29 = vld [vmem:[%s1246_s1 + $0x50] sm:$0xff]  ;;  %v58_v30 = vld [vmem:[%s1246_s1 + $0x68] sm:$0xff]  ;;  %v57_v31 = vld [vmem:[%s1246_s1 + $0x60] sm:$0xff] }
   0xb   :  { %v60_v32 = vld [vmem:[%s1246_s1 + $0x78] sm:$0xff]  ;;  %v59_v33 = vld [vmem:[%s1246_s1 + $0x70] sm:$0xff]  ;;  %v360_v36 = vld [vmem:[%s1247_s3 + $0x28] sm:$0xff] }
   0xc   :  { %v362_v34 = vld [vmem:[%s1247_s3 + $0x38] sm:$0xff]  ;;  %v361_v35 = vld [vmem:[%s1247_s3 + $0x30] sm:$0xff]  ;;  %v359_v37 = vld [vmem:[%s1247_s3 + $0x20] sm:$0xff] }
   0xd   :  { %862 = vmatpush3.msra.mxu0 %v362_v34  ;;  %v358_v38 = vld [vmem:[%s1247_s3 + $0x18] sm:$0xff]  ;;  %v357_v39 = vld [vmem:[%s1247_s3 + $0x10] sm:$0xff]  ;;  %v356_v40 = vld [vmem:[%s1247_s3 + $0x8] sm:$0xff] }
   0xe   :  { %85 = vperm.xlu1 %911, %v36_v8   ;;  %82 = vperm.xlu0 %910, %v35_v9   ;;  %v355_v41 = vld [vmem:[%s1247_s3] sm:$0xff] }
   0xf   :  { %863 = vmatprep.subr.mxu0 %v925_v5 }
  0x10   :  { %864 = vmatpush3.msra.mxu0 %v361_v35 }
  0x11   :  { %865 = vmatprep.subr.mxu0 %v925_v5 }
  0x12   :  { %166 = vperm.xlu1 %911, %v46_v10   ;;  %161 = vperm.xlu0 %910, %v45_v11  }
  0x13   :  { %866 = vmatpush3.msra.mxu0 %v360_v36 }
  0x14   :  { %867 = vmatprep.subr.mxu0 %v925_v5 }
  0x15   :  { %868 = vmatpush3.msra.mxu0 %v359_v37 }
  0x16   :  { %176 = vperm.xlu1 %911, %v48_v12   ;;  %171 = vperm.xlu0 %910, %v47_v13  }
  0x17   :  { %869 = vmatprep.subr.mxu0 %v925_v5 }
  0x18   :  { %870 = vmatpush3.msra.mxu0 %v358_v38 }
  0x19   :  { %871 = vmatprep.subr.mxu0 %v925_v5 }
  0x1a   :  { %91 = vperm.xlu1 %911, %v38_v14   ;;  %88 = vperm.xlu0 %910, %v37_v15  }
  0x1b   :  { %872 = vmatpush3.msra.mxu0 %v357_v39 }
  0x1c   :  { %873 = vmatprep.subr.mxu0 %v925_v5 }
  0x1d   :  { %874 = vmatpush3.msra.mxu0 %v356_v40 }
  0x1e   :  { %186 = vperm.xlu1 %911, %v50_v16   ;;  %181 = vperm.xlu0 %910, %v49_v17  }
  0x1f   :  { %875 = vmatprep.subr.mxu0 %v925_v5 }
  0x20   :  { %876 = vmatpush3.msra.mxu0 %v355_v41 }
  0x21   :  { %902 = vmatprep.subr.mxu0 %v925_v5 }
  0x22   :  { %97 = vperm.xlu1 %911, %v40_v18   ;;  %94 = vperm.xlu0 %910, %v39_v19  }
  0x26   :  { %196 = vperm.xlu1 %911, %v52_v20   ;;  %191 = vperm.xlu0 %910, %v51_v21  }
  0x2a   :  { %103 = vperm.xlu1 %911, %v42_v22   ;;  %100 = vperm.xlu0 %910, %v41_v23  }
  0x2e   :  { %206 = vperm.xlu1 %911, %v54_v24   ;;  %201 = vperm.xlu0 %910, %v53_v25  }
  0x32   :  { %109 = vperm.xlu1 %911, %v44_v26   ;;  %106 = vperm.xlu0 %910, %v43_v27  }
  0x36   :  { %216 = vperm.xlu1 %911, %v56_v28   ;;  %211 = vperm.xlu0 %910, %v55_v29  }
  0x3a   :  { %226 = vperm.xlu1 %911, %v58_v30   ;;  %221 = vperm.xlu0 %910, %v57_v31  }
  0x3e   :  { %236 = vperm.xlu1 %911, %v60_v32   ;;  %231 = vperm.xlu0 %910, %v59_v33  }
  0x7d   :  { %v71_v42 = vpop.permute.xlu1 %70  ;;  %v65_v43 = vpop.permute.xlu0 %64 }
  0x7e   :  { %vm113_vm1 = vcmp.eq.s32.totalorder %v71_v42, %v1107_v57  ;;  %vm111_vm5 = vcmp.eq.s32.totalorder %v65_v43, %v1107_v57 }
  0x7f   :  { %v812_v63 = vsel %vm113_vm1, 1.0, %v925_v5  ;;  %v810_v11 = vsel %vm111_vm5, 1.0, %v925_v5  ;;  %vm340_vm5 = vcmask 1043459  }
  0x81   :  { %v74_v44 = vpop.permute.xlu1 %73  ;;  %v68_v45 = vpop.permute.xlu0 %67 }
  0x82   :  { %vm114_vm2 = vcmp.eq.s32.totalorder %v74_v44, %v1107_v57  ;;  %vm112_vm6 = vcmp.eq.s32.totalorder %v68_v45, %v1107_v57 }
  0x83   :  { %v813_v62 = vsel %vm114_vm2, 1.0, %v925_v5  ;;  %v811_v7 = vsel %vm112_vm6, 1.0, %v925_v5  ;;  %vm342_vm6 = vcmask 1044484  }
  0x85   :  { %v80_v46 = vpop.permute.xlu1 %79  ;;  %v77_v47 = vpop.permute.xlu0 %76 }
  0x86   :  { %vm116_vm3 = vcmp.eq.s32.totalorder %v80_v46, %v1107_v57  ;;  %vm115_vm4 = vcmp.eq.s32.totalorder %v77_v47, %v1107_v57 }
  0x87   :  { %v815_v2 = vsel %vm116_vm3, 1.0, %v925_v5  ;;  %v814_v3 = vsel %vm115_vm4, 1.0, %v925_v5  ;;  %vm336_vm3 = vcmask 1041409   ;;  %vm338_vm4 = vcmask 1042434  }
  0x89   :  { %v86_v48 = vpop.permute.xlu1 %85  ;;  %v83_v49 = vpop.permute.xlu0 %82 }
  0x8a   :  { %vm118_vm7 = vcmp.eq.s32.totalorder %v86_v48, %v1107_v57  ;;  %vm117_vm8 = vcmp.eq.s32.totalorder %v83_v49, %v1107_v57 }
  0x8b   :  { %v817_v12 = vsel %vm118_vm7, 1.0, %v925_v5  ;;  %v816_v13 = vsel %vm117_vm8, 1.0, %v925_v5  ;;  %vm344_vm7 = vcmask 1045509   ;;  %vm346_vm8 = vcmask 1046534  }
  0x8d   :  { %v167_v50 = vpop.permute.xlu1 %166  ;;  %v162_v51 = vpop.permute.xlu0 %161 }
  0x8e   :  { %v240_v10 = vmul.f32 %v811_v7, %v167_v50  ;;  %v239_v14 = vmul.f32 %v810_v11, %v162_v51 }
  0x90   :  { %v257_v23 = vsel %vm255_vm9, %v240_v10, 0.0  ;;  %v256_v24 = vsel %vm255_vm9, %v239_v14, 0.0 }
  0x91   :  { %v177_v52 = vpop.permute.xlu1 %176  ;;  %v172_v53 = vpop.permute.xlu0 %171  ;;  %v258_v35 = vadd.f32 %v257_v23, %v256_v24 }
  0x92   :  { %v242_v0 = vmul.f32 %v813_v62, %v177_v52  ;;  %v241_v1 = vmul.f32 %v812_v63, %v172_v53 }
  0x93   :  { %v259_v44 = vrot.slane %v258_v35, 4 }
  0x94   :  { %v266_v17 = vsel %vm255_vm9, %v242_v0, 0.0  ;;  %v265_v18 = vsel %vm255_vm9, %v241_v1, 0.0 }
  0x95   :  { %v92_v55 = vpop.permute.xlu1 %91  ;;  %v89_v56 = vpop.permute.xlu0 %88  ;;  %v267_v25 = vadd.f32 %v266_v17, %v265_v18 }
  0x96   :  { %vm120_vm10 = vcmp.eq.s32.totalorder %v92_v55, %v1107_v57  ;;  %vm119_vm11 = vcmp.eq.s32.totalorder %v89_v56, %v1107_v57  ;;  %v260_v56 = vadd.f32 %v259_v44, %v258_v35 }
  0x97   :  { %v819_v29 = vsel %vm120_vm10, 1.0, %v925_v5  ;;  %v818_v31 = vsel %vm119_vm11, 1.0, %v925_v5  ;;  %v268_v37 = vrot.slane %v267_v25, 4  ;;  %vm348_vm10 = vcmask 1047559  }
  0x99   :  { %v187_v58 = vpop.permute.xlu1 %186  ;;  %v182_v59 = vpop.permute.xlu0 %181  ;;  %v269_v46 = vadd.f32 %v268_v37, %v267_v25 }
  0x9a   :  { %v244_v8 = vmul.f32 %v815_v2, %v187_v58  ;;  %v243_v9 = vmul.f32 %v814_v3, %v182_v59 }
  0x9b   :  { %v270_v59 = vrot.slane %v269_v46, 2 }
  0x9c   :  { %v275_v21 = vsel %vm255_vm9, %v244_v8, 0.0  ;;  %v274_v22 = vsel %vm255_vm9, %v243_v9, 0.0  ;;  %v261_v8 = vrot.slane %v260_v56, 2 }
  0x9d   :  { %v1111_v60 = vpop.permute.xlu1 %97  ;;  %v1113_v61 = vpop.permute.xlu0 %94  ;;  %v276_v28 = vadd.f32 %v275_v21, %v274_v22  ;;  %v271_v11 = vadd.f32 %v270_v59, %v269_v46 }
  0x9e   :  { %vm122_vm12 = vcmp.eq.s32.totalorder %v1111_v60, %v1107_v57  ;;  %vm121_vm13 = vcmp.eq.s32.totalorder %v1113_v61, %v1107_v57  ;;  %v262_v24 = vadd.f32 %v261_v8, %v260_v56 }
  0x9f   :  { %v277_v40 = vrot.slane %v276_v28, 4  ;;  %v821_v49 = vsel %vm122_vm12, 1.0, %v925_v5  ;;  %v820_v51 = vsel %vm121_vm13, 1.0, %v925_v5  ;;  %vm752_vm12 = vcmask 27648  }
  0xa1   :  { %v197_v4 = vpop.permute.xlu1 %196  ;;  %v192_v6 = vpop.permute.xlu0 %191  ;;  %v278_v48 = vadd.f32 %v277_v40, %v276_v28 }
  0xa2   :  { %v246_v15 = vmul.f32 %v817_v12, %v197_v4  ;;  %v245_v16 = vmul.f32 %v816_v13, %v192_v6 }
  0xa3   :  { %v279_v63 = vrot.slane %v278_v48, 2 }
  0xa4   :  { %v284_v26 = vsel %vm255_vm9, %v246_v15, 0.0  ;;  %v283_v27 = vsel %vm255_vm9, %v245_v16, 0.0 }
  0xa5   :  { %v104_v19 = vpop.permute.xlu1 %103  ;;  %v101_v20 = vpop.permute.xlu0 %100  ;;  %v285_v36 = vadd.f32 %v284_v26, %v283_v27  ;;  %v280_v21 = vadd.f32 %v279_v63, %v278_v48 }
  0xa6   :  { %vm124_vm14 = vcmp.eq.s32.totalorder %v104_v19, %v1107_v57  ;;  %vm123_vm15 = vcmp.eq.s32.totalorder %v101_v20, %v1107_v57 }
  0xa7   :  { %v286_v45 = vrot.slane %v285_v36, 4  ;;  %v823_v1 = vsel %vm124_vm14, 1.0, %v925_v5  ;;  %v822_v3 = vsel %vm123_vm15, 1.0, %v925_v5  ;;  %v281_v35 = vrot.slane %v280_v21, 1 }
  0xa9   :  { %v207_v30 = vpop.permute.xlu1 %206  ;;  %v202_v32 = vpop.permute.xlu0 %201  ;;  %v287_v58 = vadd.f32 %v286_v45, %v285_v36  ;;  %v263_v36 = vrot.slane %v262_v24, 1  ;;  %v282_v45 = vadd.f32 %v281_v35, %v280_v21 }
  0xaa   :  { %v248_v33 = vmul.f32 %v819_v29, %v207_v30  ;;  %v247_v34 = vmul.f32 %v818_v31, %v202_v32  ;;  %v272_v31 = vrot.slane %v271_v11, 1 }
  0xab   :  { %v288_v9 = vrot.slane %v287_v58, 2  ;;  %v264_v46 = vadd.f32 %v263_v36, %v262_v24  ;;  %v829_v24 = vld [vmem:[%s1251_s7] ss:$0 sm:$0xff] }
  0xac   :  { %v293_v38 = vsel %vm255_vm9, %v248_v33, 0.0  ;;  %v292_v39 = vsel %vm255_vm9, %v247_v34, 0.0 }
  0xad   :  { %v294_v41 = vadd.f32 %v293_v38, %v292_v39  ;;  %v110_v42 = vpop.permute.xlu1 %109  ;;  %v107_v43 = vpop.permute.xlu0 %106  ;;  %v289_v25 = vadd.f32 %v288_v9, %v287_v58 }
  0xae   :  { %vm126_vm1 = vcmp.eq.s32.totalorder %v110_v42, %v1107_v57  ;;  %vm125_vm2 = vcmp.eq.s32.totalorder %v107_v43, %v1107_v57 }
  0xaf   :  { %v295_v47 = vrot.slane %v294_v41, 4  ;;  %v825_v17 = vsel %vm126_vm1, 1.0, %v925_v5  ;;  %v824_v19 = vsel %vm125_vm2, 1.0, %v925_v5  ;;  %v290_v37 = vrot.slane %v289_v25, 1 }
  0xb0   :  { %vm660_vm1 = vcmask 7168  }
  0xb1   :  { %v217_v50 = vpop.permute.xlu1 %216  ;;  %v212_v52 = vpop.permute.xlu0 %211  ;;  %v296_v60 = vadd.f32 %v295_v47, %v294_v41  ;;  %v273_v41 = vadd.f32 %v272_v31, %v271_v11  ;;  %v291_v47 = vadd.f32 %v290_v37, %v289_v25  ;;  %v607_v37 = vld [vmem:[%s1252_s2] sm:$0xff] }
  0xb2   :  { %v250_v53 = vmul.f32 %v821_v49, %v217_v50  ;;  %v249_v55 = vmul.f32 %v820_v51, %v212_v52 }
  0xb3   :  { %v297_v12 = vrot.slane %v296_v60, 2  ;;  %v337_v51 = vsel %vm336_vm3, %v273_v41, %v264_v46  ;;  %vm770_vm3 = vcmask 1043456  }
  0xb4   :  { %v302_v61 = vsel %vm255_vm9, %v250_v53, 0.0  ;;  %v301_v62 = vsel %vm255_vm9, %v249_v55, 0.0  ;;  %v339_v55 = vsel %vm338_vm4, %v282_v45, %v337_v51  ;;  %vm780_vm4 = vcmp.eq.s32.totalorder %v1107_v57, 0 }
  0xb5   :  { %v303_v0 = vadd.f32 %v302_v61, %v301_v62  ;;  %v227_v2 = vpop.permute.xlu1 %226  ;;  %v222_v4 = vpop.permute.xlu0 %221  ;;  %v298_v28 = vadd.f32 %v297_v12, %v296_v60  ;;  %v341_v59 = vsel %vm340_vm5, %v291_v47, %v339_v55  ;;  %vm784_vm5 = vcmp.eq.s32.totalorder %v1107_v57, 1 }
  0xb6   :  { %v252_v6 = vmul.f32 %v823_v1, %v227_v2  ;;  %v251_v7 = vmul.f32 %v822_v3, %v222_v4  ;;  %v440_v2 = vld [vmem:[%s1248_s4 + $0x18] sm:$0xff]  ;;  %v439_v3 = vld [vmem:[%s1248_s4 + $0x10] sm:$0xff]  ;;  %v438_v4 = vld [vmem:[%s1248_s4 + $0x8] sm:$0xff] }
  0xb7   :  { %v304_v10 = vrot.slane %v303_v0, 4  ;;  %v299_v40 = vrot.slane %v298_v28, 1  ;;  %881 = vmatpush3.msra.mxu1 %v440_v2 }
  0xb8   :  { %v311_v13 = vsel %vm255_vm9, %v252_v6, 0.0  ;;  %v310_v14 = vsel %vm255_vm9, %v251_v7, 0.0  ;;  %882 = vmatprep.subr.mxu1 %v925_v5  ;;  %v437_v6 = vld [vmem:[%s1248_s4] sm:$0xff] }
  0xb9   :  { %v305_v15 = vadd.f32 %v304_v10, %v303_v0  ;;  %v312_v16 = vadd.f32 %v311_v13, %v310_v14  ;;  %v237_v18 = vpop.permute.xlu1 %236  ;;  %v232_v20 = vpop.permute.xlu0 %231  ;;  %v300_v50 = vadd.f32 %v299_v40, %v298_v28  ;;  %883 = vmatpush3.msra.mxu1 %v439_v3  ;;  %v526_v13 = vld [vmem:[%s1249_s6 + $0x18] sm:$0xff]  ;;  %v525_v14 = vld [vmem:[%s1249_s6 + $0x10] sm:$0xff] }
  0xba   :  { %v254_v22 = vmul.f32 %v825_v17, %v237_v18  ;;  %v253_v23 = vmul.f32 %v824_v19, %v232_v20  ;;  %884 = vmatprep.subr.mxu1 %v925_v5  ;;  %v827_v17 = vld [vmem:[%s1250_s5] ss:$0 sm:$0xff] }
  0xbb   :  { %v306_v26 = vrot.slane %v305_v15, 2  ;;  %v313_v27 = vrot.slane %v312_v16, 4  ;;  %v343_v60 = vsel %vm342_vm6, %v300_v50, %v341_v59  ;;  %885 = vmatpush3.msra.mxu1 %v438_v4  ;;  %v748_v50 = vshrl.u32 %v61_v54, 7 }
  0xbc   :  { %v320_v29 = vsel %vm255_vm9, %v254_v22, 0.0  ;;  %v319_v30 = vsel %vm255_vm9, %v253_v23, 0.0  ;;  %886 = vmatprep.subr.mxu1 %v925_v5  ;;  %vm794_vm6 = vcmp.eq.s32.totalorder %v1107_v57, 2 }
  0xbd   :  { %v307_v32 = vadd.f32 %v306_v26, %v305_v15  ;;  %v314_v33 = vadd.f32 %v313_v27, %v312_v16  ;;  %v321_v34 = vadd.f32 %v320_v29, %v319_v30  ;;  %887 = vmatpush3.msra.mxu1 %v437_v6  ;;  %v524_v15 = vld [vmem:[%s1249_s6 + $0x8] sm:$0xff]  ;;  %v523_v16 = vld [vmem:[%s1249_s6] sm:$0xff]  ;;  %vm749_vm15 = vcmp.eq.s32.totalorder %v748_v50, %v1107_v57 }
  0xbe   :  { %891 = vmatprep.subr.mxu1 %v925_v5 }
  0xbf   :  { %v315_v38 = vrot.slane %v314_v33, 2  ;;  %v322_v39 = vrot.slane %v321_v34, 4  ;;  %v308_v42 = vrot.slane %v307_v32, 1 }
  0xc1   :  { %v316_v43 = vadd.f32 %v315_v38, %v314_v33  ;;  %v323_v44 = vadd.f32 %v322_v39, %v321_v34  ;;  %v309_v52 = vadd.f32 %v308_v42, %v307_v32 }
  0xc3   :  { %v317_v48 = vrot.slane %v316_v43, 1  ;;  %v324_v49 = vrot.slane %v323_v44, 2  ;;  %v345_v62 = vsel %vm344_vm7, %v309_v52, %v343_v60  ;;  %vm800_vm7 = vcmp.eq.s32.totalorder %v1107_v57, 3 }
  0xc5   :  { %v325_v53 = vadd.f32 %v324_v49, %v323_v44  ;;  %v318_v56 = vadd.f32 %v317_v48, %v316_v43 }
  0xc7   :  { %v326_v58 = vrot.slane %v325_v53, 1  ;;  %v347_v63 = vsel %vm346_vm8, %v318_v56, %v345_v62  ;;  %v835_v56 = vsel %vm749_vm15, 1.0, %v925_v5 }
  0xc9   :  { %v327_v61 = vadd.f32 %v326_v58, %v325_v53 }
  0xcb   :  { %v349_v0 = vsel %vm348_vm10, %v327_v61, %v347_v63 }
  0xcc   :  { %878 = vmatmul.mubr.msk.f32.vlgmr.msra.gmra.mxu0 %vm255_vm9, %v349_v0  ;;  %v351_v1 = vsel %vm255_vm9, %v349_v0, 0.0  ;;  %vm448_vm9 = vcmask 261120  }
  0xcd   :  { %352 = vadd.xlane.f32.xlu0 %v351_v1  ;;  %904 = vmatprep.mubr.msk.f32.mxu0 %vm926_vm0, %v925_v5 }
 0x156   :  { %v353_v7 = vpop.xlane.xlu0 %352 }
 0x157   :  { %v354_v8 = vadd.f32 1e-06, %v353_v7 }
 0x159   :  { %912 = vrcp.f32 %v354_v8 }
 0x166   :  { %v913_v9 = vpop.eup %912 }
 0x18c   :  { %v431_v10 = vpop.f32.mrf.mxu0 }
 0x18d   :  { %v436_v11 = vmul.f32 %v913_v9, %v431_v10 }
 0x18e   :  { %v879_v12 = vpop.f32.mrf.mxu0 }
 0x18f   :  { %889 = vmatmul.mubr.msk.f32.vlgmr.msra.gmra.mxu1 %vm448_vm9, %v436_v11 }
 0x190   :  { %899 = vmatprep.mubr.msk.f32.mxu1 %vm926_vm0, %v925_v5  ;;  %892 = vmatpush3.msra.mxu1 %v526_v13  ;;  %vm614_vm0 = vcmask 15360  }
 0x191   :  { %893 = vmatprep.subr.mxu1 %v925_v5 }
 0x192   :  { %894 = vmatpush3.msra.mxu1 %v525_v14 }
 0x193   :  { %895 = vmatprep.subr.mxu1 %v925_v5 }
 0x194   :  { %896 = vmatpush3.msra.mxu1 %v524_v15 }
 0x195   :  { %897 = vmatprep.subr.mxu1 %v925_v5 }
 0x196   :  { %898 = vmatpush3.msra.mxu1 %v523_v16 }
 0x24f   :  { %v518_v18 = vpop.f32.mrf.mxu1 }
 0x250   :  { %v519_v19 = vadd.f32 %v827_v17, %v518_v18 }
 0x251   :  { %v890_v20 = vpop.f32.mrf.mxu1 }
 0x252   :  { %914 = vtanh.f32 %v519_v19 }
 0x25f   :  { %v915_v21 = vpop.eup %914 }
 0x260   :  { %900 = vmatmul.mubr.msk.f32.vlgmr.msra.gmra.mxu1 %vm448_vm9, %v915_v21  ;;  %v671_v22 = vrot.slane %v915_v21, 4  ;;  %v670_v23 = vmul.f32 20.0, %v915_v21 }
 0x262   :  { %903 = vmatpush3.xpose.msk.msra.mxu0 %vm448_vm9, %v671_v22 }
 0x265   :  { %905 = vmatmul.mubr.msk.f32.vlgmr.msra.gmra.mxu0 %vm448_vm9, %v670_v23 }
 0x320   :  { %v603_v25 = vpop.f32.mrf.mxu1 }
 0x321   :  { %v604_v26 = vadd.f32 %v829_v24, %v603_v25 }
 0x322   :  { %v901_v27 = vpop.f32.mrf.mxu1 }
 0x323   :  { %v615_v28 = vsel %vm614_vm0, %v604_v26, -inf }
 0x324   :  { %616 = vmax.xlane.f32.xlu1 %v615_v28 }
 0x325   :  { %v743_v29 = vpop.f32.mrf.mxu0 }
 0x326   :  { %v753_v36 = vsel %vm752_vm12, %v743_v29, -inf  ;;  %v765_v59 = vmul.f32 %v835_v56, %v743_v29 }
 0x327   :  { %v906_v30 = vpop.f32.mrf.mxu0 }
 0x328   :  { %v766_v60 = vsel %vm752_vm12, %v765_v59, 0.0 }
 0x3ad   :  { %v1213_v31 = vpop.xlane.xlu1 %616 }
 0x3ae   :  { %vm640_vm11 = vcmp.eq.f32.partialorder %v604_v26, %v1213_v31  ;;  %v618_v38 = vsub.f32 %v604_v26, %v1213_v31 }
 0x3af   :  { %v641_v32 = vsel %vm640_vm11, %v1107_v57, 2 }
 0x3b0   :  { %v642_v33 = vsel %vm614_vm0, %v641_v32, 2147483647  ;;  %v619_v39 = vmul.f32 1.442695, %v618_v38 }
 0x3b1   :  { %v644_v34 = vshra.s32 %v642_v33, 16  ;;  %v643_v40 = vand.u32 65535, %v642_v33 }
 0x3b2   :  { %916 = vpow2.f32 %v619_v39  ;;  %v836_v39 = vsel %vm780_vm4, 1.0, %v925_v5 }
 0x3b3   :  { %v646_v35 = vcvt.s32.f32 %v644_v34  ;;  %v645_v42 = vcvt.s32.f32 %v643_v40  ;;  %v837_v40 = vsel %vm784_vm5, 1.0, %v925_v5 }
 0x3b5   :  { %647 = vmin.xlane.f32.xlu0 %v646_v35 }
 0x3b9   :  { %754 = vmax.xlane.f32.xlu0 %v753_v36 }
 0x3bf   :  { %v917_v44 = vpop.eup %916 }
 0x3c0   :  { %v621_v47 = vsel %vm614_vm0, %v917_v44, 0.0 }
 0x3cf   :  { %609 = vperm.xlu0 %910, %v607_v37  }
 0x43e   :  { %v648_v41 = vpop.xlane.xlu0 %647 }
 0x43f   :  { %vm649_vm13 = vcmp.eq.f32.partialorder %v646_v35, %v648_v41  ;;  %v654_v61 = vcvt.f32.s32 %v648_v41  ;;  %v838_v41 = vsel %vm794_vm6, 1.0, %v925_v5 }
 0x440   :  { %v650_v43 = vsel %vm649_vm13, %v645_v42, inf }
 0x441   :  { %651 = vmin.xlane.f32.xlu1 %v650_v43  ;;  %v655_v62 = vshll.u32 %v654_v61, 16 }
 0x442   :  { %v755_v45 = vpop.xlane.xlu0 %754 }
 0x443   :  { %v756_v46 = vsub.f32 %v743_v29, %v755_v45 }
 0x445   :  { %v757_v48 = vmul.f32 1.442695, %v756_v46  ;;  %622 = vadd.xlane.f32.xlu1 %v621_v47  ;;  %v839_v46 = vsel %vm800_vm7, 1.0, %v925_v5 }
 0x447   :  { %918 = vpow2.f32 %v757_v48 }
 0x44a   :  { %v610_v49 = vpop.permute.xlu0 %609 }
 0x44b   :  { %vm611_vm14 = vcmp.eq.s32.totalorder %v1107_v57, %v610_v49 }
 0x44c   :  { %v831_v51 = vsel %vm611_vm14, 1.0, %v925_v5 }
 0x44d   :  { %v627_v55 = vmul.f32 %v831_v51, %v604_v26 }
 0x44f   :  { %v628_v58 = vsel %vm614_vm0, %v627_v55, 0.0 }
 0x454   :  { %v919_v52 = vpop.eup %918 }
 0x455   :  { %v759_v53 = vsel %vm752_vm12, %v919_v52, 0.0 }
 0x456   :  { %760 = vadd.xlane.f32.xlu1 %v759_v53 }
 0x45a   :  { %629 = vadd.xlane.f32.xlu1 %v628_v58 }
 0x45e   :  { %767 = vadd.xlane.f32.xlu1 %v766_v60 }
 0x4ca   :  { %v652_v54 = vpop.xlane.xlu1 %651 }
 0x4cb   :  { %v653_v63 = vcvt.f32.s32 %v652_v54 }
 0x4cd   :  { %v656_v0 = vadd.s32 %v655_v62, %v653_v63 }
 0x4ce   :  { %v623_v12 = vpop.xlane.xlu1 %622 }
 0x4cf   :  { %vm657_vm2 = vcmp.eq.s32.totalorder %v656_v0, %v607_v37 }
 0x4d0   :  { %v832_v1 = vsel %vm657_vm2, 1.0, %v925_v5 }
 0x4d1   :  { %v661_v2 = vsel %vm660_vm1, %v832_v1, 0.0 }
 0x4d2   :  { %v662_v3 = vrot.slane %v661_v2, 4 }
 0x4d4   :  { %v663_v4 = vadd.f32 %v662_v3, %v661_v2 }
 0x4d6   :  { %v664_v6 = vrot.slane %v663_v4, 2 }
 0x4d8   :  { %v665_v7 = vadd.f32 %v664_v6, %v663_v4 }
 0x4da   :  { %v666_v8 = vrot.slane %v665_v7, 1 }
 0x4dc   :  { %v667_v9 = vadd.f32 %v666_v8, %v665_v7 }
 0x4de   :  { %v668_v10 = vmul.f32 100.0, %v667_v9 }
 0x4df   :  { %v761_v13 = vpop.xlane.xlu1 %760 }
 0x4e0   :  { %v669_v11 = vmul.f32 0.125, %v668_v10  ;;  %920 = vlog2.f32 %v761_v13 }
 0x4e1   :  { %922 = vlog2.f32 %v623_v12 }
 0x4e2   :  { %789 = vperm.xlu1 %911, %v669_v11  }
 0x4e3   :  { %v630_v16 = vpop.xlane.xlu1 %629 }
 0x4e7   :  { %v768_v20 = vpop.xlane.xlu1 %767 }
 0x4ed   :  { %v921_v14 = vpop.eup %920 }
 0x4ee   :  { %v763_v15 = vmul.f32 0.6931472, %v921_v14  ;;  %v923_v17 = vpop.eup %922 }
 0x4ef   :  { %v625_v19 = vmul.f32 0.6931472, %v923_v17 }
 0x4f0   :  { %v764_v18 = vadd.f32 %v763_v15, %v755_v45 }
 0x4f1   :  { %v626_v22 = vadd.f32 %v625_v19, %v1213_v31 }
 0x4f2   :  { %v769_v21 = vsub.f32 %v764_v18, %v768_v20 }
 0x4f3   :  { %v631_v23 = vsub.f32 %v626_v22, %v630_v16 }
 0x4f4   :  { %v771_v24 = vsel %vm770_vm3, %v769_v21, 0.0 }
 0x4f5   :  { %v632_v25 = vrot.slane %v631_v23, 4  ;;  %v772_v26 = vrot.slane %v771_v24, 4 }
 0x4f7   :  { %v633_v27 = vadd.f32 %v632_v25, %v631_v23  ;;  %v773_v28 = vadd.f32 %v772_v26, %v771_v24 }
 0x4f9   :  { %v634_v29 = vrot.slane %v633_v27, 2  ;;  %v774_v30 = vrot.slane %v773_v28, 2 }
 0x4fb   :  { %v635_v32 = vadd.f32 %v634_v29, %v633_v27  ;;  %v775_v33 = vadd.f32 %v774_v30, %v773_v28 }
 0x4fd   :  { %v636_v34 = vrot.slane %v635_v32, 1  ;;  %v776_v35 = vrot.slane %v775_v33, 1 }
 0x4ff   :  { %v637_v36 = vadd.f32 %v636_v34, %v635_v32  ;;  %v777_v37 = vadd.f32 %v776_v35, %v775_v33 }
 0x501   :  { %v779_v31 = vmul.f32 0.25, %v777_v37  ;;  %v639_v38 = vmul.f32 0.125, %v637_v36 }
 0x503   :  { %v783_v43 = vmul.f32 %v836_v39, %v639_v38  ;;  %v799_v44 = vadd.f32 %v779_v31, %v639_v38  ;;  %v797_v47 = vmul.f32 %v838_v41, %v779_v31 }
 0x505   :  { %v803_v49 = vmul.f32 %v839_v46, %v799_v44 }
 0x55d   :  { %v790_v42 = vpop.permute.xlu1 %789 }
 0x55e   :  { %v792_v45 = vmul.f32 %v837_v40, %v790_v42 }
 0x560   :  { %v793_v48 = vadd.f32 %v792_v45, %v783_v43 }
 0x562   :  { %v798_v50 = vadd.f32 %v797_v47, %v793_v48 }
 0x564   :  { %v804_v51 = vadd.f32 %v803_v49, %v798_v50 }
 0x566   :  { %805 = vst [vmem:[%s1253_s8] sm:$0x1] %v804_v51 }

</bundles_post_ra>
